<compile_context>
chip_gen: v7x
topology: tpu7x:2x2x1
jax: 0.10.0
libtpu: 0.0.40
codegen_flags: <defaults>
</compile_context>

<pallas_src>
import jax
import jax.numpy as jnp
import numpy as np
from jax.experimental import pallas as pl
from jax.experimental.pallas import tpu as pltpu

_LANES = 128                       # vreg lane width (fast axis)
_BLOCK_BYTES = 4 * 1024 * 1024     # ~4 MiB per buffer per block (dtype-agnostic)
_VMEM_LIMIT_BYTES = 32 * 1024 * 1024  # 2 in + 1 out, double-buffered 4 MiB blocks


def _add_kernel(a_ref, b_ref, o_ref):
    # one lane-dense tile: a single unmasked vector add + unmasked store
    o_ref[...] = a_ref[...] + b_ref[...]


def _tiled_add_2d(a2, b2, dtype, block_rows):
    rows = a2.shape[0]
    grid = (pl.cdiv(rows, block_rows),)   # tail block (if any) masked by Pallas
    return pl.pallas_call(
        _add_kernel,
        out_shape=jax.ShapeDtypeStruct((rows, _LANES), dtype),
        grid=grid,
        in_specs=[
            pl.BlockSpec((block_rows, _LANES), lambda i: (i, 0)),
            pl.BlockSpec((block_rows, _LANES), lambda i: (i, 0)),
        ],
        out_specs=pl.BlockSpec((block_rows, _LANES), lambda i: (i, 0)),
        compiler_params=pltpu.CompilerParams(
            dimension_semantics=("parallel",),
            vmem_limit_bytes=_VMEM_LIMIT_BYTES,
        ),
    )(a2, b2)


def pallas_add(x1, x2):
    """Elementwise x1 + x2 (with broadcasting), via a tiled lane-dense Pallas kernel."""
    out_shape = jnp.broadcast_shapes(x1.shape, x2.shape)
    dtype = jnp.result_type(x1.dtype, x2.dtype)
    size = int(np.prod(out_shape)) if len(out_shape) else 1

    if size == 0:
        return jnp.zeros(out_shape, dtype)

    # Common HSFPN case: identical shapes -> no broadcast materialization in HBM.
    if x1.shape == out_shape:
        a = x1.astype(dtype)
    else:
        # TODO(synk): express the broadcast through the BlockSpec index_map
        # instead of materializing the expanded operand in HBM.
        a = jnp.broadcast_to(x1.astype(dtype), out_shape)
    if x2.shape == out_shape:
        b = x2.astype(dtype)
    else:
        b = jnp.broadcast_to(x2.astype(dtype), out_shape)

    a = a.reshape(-1)
    b = b.reshape(-1)

    itemsize = jnp.dtype(dtype).itemsize
    sub = 8 * max(1, 4 // itemsize)        # sublane granularity per dtype packing

    # Only pad to the 128-lane row width when the flat size is misaligned
    # (feature-map sizes like N*C*H*W are normally already multiples of 128).
    pad = (-size) % _LANES
    if pad:
        a = jnp.pad(a, (0, pad))
        b = jnp.pad(b, (0, pad))
    rows = (size + pad) // _LANES

    # Byte-budgeted block: ~_BLOCK_BYTES per buffer, rounded to a sublane multiple.
    target_rows = max(sub, (_BLOCK_BYTES // (_LANES * itemsize)) // sub * sub)
    if rows <= target_rows:
        block_rows = rows                  # full-extent block: always legal, grid=(1,)
    else:
        block_rows = target_rows           # partial tail block is masked by Pallas

    out = _tiled_add_2d(
        a.reshape(rows, _LANES), b.reshape(rows, _LANES), dtype, block_rows
    )

    if pad:
        out = out.reshape(-1)[:size]
    return out.reshape(out_shape)


if __name__ == "__main__":
    key = jax.random.PRNGKey(0)
    k1, k2 = jax.random.split(key)

    # Add.forward(x) with x = (input1, input2); small NCHW feature maps.
    N, C, H, W = 2, 4, 16, 16
    x1 = jax.random.normal(k1, (N, C, H, W), jnp.float32)
    x2 = jax.random.normal(k2, (N, C, H, W), jnp.float32)

    out = jax.block_until_ready(jax.jit(pallas_add)(x1, x2))
    ref = x1 + x2

    assert out.shape == ref.shape
    np.testing.assert_allclose(np.asarray(out), np.asarray(ref), rtol=1e-6, atol=1e-6)
    print("KERNEL_OK")
</pallas_src>

<mosaic_0001>
module attributes {stable_mosaic.version = 11 : i64} {
  func.func @_add_kernel(%arg0: i32, %arg1: memref<16x128xf32, #tpu.memory_space<vmem>>, %arg2: memref<16x128xf32, #tpu.memory_space<vmem>>, %arg3: memref<16x128xf32, #tpu.memory_space<vmem>>) attributes {dimension_semantics = [#tpu.dimension_semantics<parallel>], iteration_bounds = array<i64: 1>, scalar_prefetch = 0 : i64, scratch_operands = 0 : i64, tpu.core_type = #tpu.core_type<tc>, window_params = [{transform_indices = @transform_0, window_bounds = array<i64: 16, 128>}, {transform_indices = @transform_1, window_bounds = array<i64: 16, 128>}, {transform_indices = @transform_2, window_bounds = array<i64: 16, 128>}]} {
    %c0 = arith.constant 0 : index
    %c0_0 = arith.constant 0 : index
    %0 = vector.load %arg1[%c0, %c0_0] : memref<16x128xf32, #tpu.memory_space<vmem>>, vector<16x128xf32>
    %c0_1 = arith.constant 0 : index
    %c0_2 = arith.constant 0 : index
    %1 = vector.load %arg2[%c0_1, %c0_2] : memref<16x128xf32, #tpu.memory_space<vmem>>, vector<16x128xf32>
    %2 = arith.addf %0, %1 : vector<16x128xf32>
    %c0_3 = arith.constant 0 : index
    %c0_4 = arith.constant 0 : index
    %3 = vector.load %arg3[%c0_3, %c0_4] : memref<16x128xf32, #tpu.memory_space<vmem>>, vector<16x128xf32>
    tpu.vector_store %arg3[%c0_3, %c0_4], %2 {strides = array<i32>} : memref<16x128xf32, #tpu.memory_space<vmem>>, vector<16x128xf32>,
    return
  }
  func.func @transform_0(%arg0: i32) -> (i32, i32) {
    %c0_i32 = arith.constant 0 : i32
    %c0_i32_0 = arith.constant 0 : i32
    return %arg0, %c0_i32 : i32, i32
  }
  func.func @transform_1(%arg0: i32) -> (i32, i32) {
    %c0_i32 = arith.constant 0 : i32
    %c0_i32_0 = arith.constant 0 : i32
    return %arg0, %c0_i32 : i32, i32
  }
  func.func @transform_2(%arg0: i32) -> (i32, i32) {
    %c0_i32 = arith.constant 0 : i32
    %c0_i32_0 = arith.constant 0 : i32
    return %arg0, %c0_i32 : i32, i32
  }
}

</mosaic_0001>

<bundles_post_ra>
// kernel: pallas_add.1
= control target key start
LH: loop header
LB: loop body
LE: loop exit
PB: predicated region body
PF: predicated region fallthrough
CT: control target
= control target key end

     0   :  { %s56_s0 = inlined_call_operand.vmem [shape: f32[16,128], index: 0, kind: input, shape index: {}]   ;;  %s57_s1 = inlined_call_operand.vmem [shape: f32[16,128], index: 1, kind: input, shape index: {}]   ;;  %s58_s2 = inlined_call_operand.vmem [shape: f32[16,128], index: 2, kind: output, shape index: {}]  }
   0x1   :  { %v11_v0 = vld [vmem:[%s56_s0] sm:$0xff]  ;;  %v12_v2 = vld [vmem:[%s56_s0 + $0x8] sm:$0xff] }
   0x2   :  { %v13_v1 = vld [vmem:[%s57_s1] sm:$0xff]  ;;  %v14_v4 = vld [vmem:[%s57_s1 + $0x8] sm:$0xff] }
   0x3   :  { %v15_v3 = vadd.f32 %v13_v1, %v11_v0  ;;  %v16_v5 = vadd.f32 %v14_v4, %v12_v2 }
   0x5   :  { %17 = vst [vmem:[%s58_s2] sm:$0xff] %v15_v3  ;;  %18 = vst [vmem:[%s58_s2 + $0x8] sm:$0xff] %v16_v5 }

</bundles_post_ra>
